<compile_context>
chip_gen: v6e
topology: v6e:2x2x1
jax: 0.10.0
libtpu: 0.0.40
codegen_flags: <defaults>
</compile_context>

<pallas_src>
import functools

import jax
import jax.numpy as jnp
from jax.experimental import pallas as pl
from jax.experimental.pallas import tpu as pltpu


def _conv2x2_relu_kernel(x_ref, w_ref, b_ref, o_ref):
    """One grid step: o = relu(W @ x + b).

    x_ref: (K, tpix)   bf16/f32  im2col^T slab (lane dim = pixels, dense)
    w_ref: (OC, K)     bf16/f32  resident across the whole grid
    b_ref: (OC, 1)     f32       resident
    o_ref: (OC, tpix)  in dtype  NCHW output slab (lane dim = pixels, dense)
    """
    acc = jnp.dot(w_ref[...], x_ref[...], preferred_element_type=jnp.float32)
    acc = acc + b_ref[...]                      # f32 bias add, broadcast over pixels
    o_ref[...] = jnp.maximum(acc, 0.0).astype(o_ref.dtype)   # f32 ReLU, cast on store


def _choose_pixel_tile(hw, n_batch, bytes_per_pixel, vmem_budget=16 << 20):
    """Pixels handled per grid step.

    Must divide hw.  A tile that is not a multiple of 128 is only layout-legal
    when it equals the full minor dim, so small/odd spatial sizes get one block
    per image.  Otherwise pick a multiple-of-128 divisor, capped so the
    double-buffered in+out blocks stay inside the VMEM budget, and keep >= 2
    grid steps when there is a single image (v7x has 2 TensorCores).
    """
    if hw % 128 != 0:
        return hw
    cap = min(2048, max(128, vmem_budget // max(bytes_per_pixel, 1)))
    if n_batch == 1:
        cap = min(cap, max(128, hw // 2))
    cap = (cap // 128) * 128
    if hw <= cap:
        return hw
    tile = 128                                   # 128 always divides hw here
    for t in range(256, cap + 1, 128):
        if hw % t == 0:
            tile = t
    return tile


@functools.partial(jax.jit, static_argnames=("matmul_dtype",))
def downscale_block_forward(x_nchw, weight, bias, *, matmul_dtype=jnp.bfloat16):
    """Conv2d(in, out, kernel_size=2, stride=2, padding=0) + ReLU (PyTorch NCHW).

    x_nchw : [N, C, H, W]
    weight : [OC, C, 2, 2]   (PyTorch OIHW layout)
    bias   : [OC]
    returns: [N, OC, H//2, W//2]  (same dtype as x)
    """
    N, C, H, W = x_nchw.shape
    OC = weight.shape[0]
    Ho, Wo = H // 2, W // 2
    if H % 2 or W % 2:                 # PyTorch floor mode: drop trailing row/col
        x_nchw = x_nchw[:, :, : 2 * Ho, : 2 * Wo]
    HW = Ho * Wo
    K = 4 * C

    # ---- one fused XLA pass: NCHW -> im2col^T (N, K, Ho*Wo), k = (kh, kw, c) ----
    xt = x_nchw.reshape(N, C, Ho, 2, Wo, 2)
    xt = jnp.transpose(xt, (0, 3, 5, 1, 2, 4))          # (N, kh, kw, C, Ho, Wo)
    xt = xt.reshape(N, K, HW).astype(matmul_dtype)

    # weight [OC, C, 2, 2] -> (OC, K) with the same (kh, kw, c) flattening
    w_mat = jnp.transpose(weight, (0, 2, 3, 1)).reshape(OC, K).astype(matmul_dtype)
    b_mat = bias.astype(jnp.float32).reshape(OC, 1)

    in_itemsize = jnp.dtype(matmul_dtype).itemsize
    bytes_per_pixel = 2 * (K * in_itemsize + OC * 4)    # double-buffered in + out
    tpix = _choose_pixel_tile(HW, N, bytes_per_pixel)
    grid = (N, HW // tpix)                              # no remainder -> no padding

    out_flat = pl.pallas_call(
        _conv2x2_relu_kernel,
        out_shape=jax.ShapeDtypeStruct((N, OC, HW), x_nchw.dtype),
        grid=grid,
        in_specs=[
            pl.BlockSpec((None, K, tpix), lambda n, p: (n, 0, p)),   # x slab
            pl.BlockSpec((OC, K), lambda n, p: (0, 0)),              # weight (resident)
            pl.BlockSpec((OC, 1), lambda n, p: (0, 0)),              # bias   (resident)
        ],
        out_specs=pl.BlockSpec((None, OC, tpix), lambda n, p: (n, 0, p)),
        compiler_params=pltpu.CompilerParams(
            dimension_semantics=("parallel", "parallel"),
            vmem_limit_bytes=32 * 1024 * 1024,
        ),
    )(xt, w_mat, b_mat)

    # Output is already NCHW; this reshape is free (no data movement).
    return out_flat.reshape(N, OC, Ho, Wo)


def _reference_forward(x_nchw, weight, bias):
    """Pure-JAX reference (lax conv) for correctness checking."""
    y = jax.lax.conv_general_dilated(
        x_nchw, weight,
        window_strides=(2, 2), padding="VALID",
        dimension_numbers=("NCHW", "OIHW", "NCHW"))
    return jnp.maximum(y + bias.reshape(1, -1, 1, 1), 0.0)


if __name__ == "__main__":
    key = jax.random.PRNGKey(0)
    kx, kw, kb = jax.random.split(key, 3)

    # ---- test 1: the module's nominal small shapes (batch=2, C=4, 16x16) ----
    N, C_IN, C_OUT, H, W = 2, 4, 8, 16, 16
    x = jax.random.normal(kx, (N, C_IN, H, W), dtype=jnp.float32)
    weight = jax.random.normal(kw, (C_OUT, C_IN, 2, 2), dtype=jnp.float32) * 0.1
    bias = jax.random.normal(kb, (C_OUT,), dtype=jnp.float32) * 0.1

    y_ref = jax.block_until_ready(_reference_forward(x, weight, bias))

    # f32 operand path (MXU default precision; modest tolerance covers bf16-pass lowering)
    y_f32 = jax.block_until_ready(
        downscale_block_forward(x, weight, bias, matmul_dtype=jnp.float32))
    assert y_f32.shape == (N, C_OUT, H // 2, W // 2), y_f32.shape
    assert jnp.allclose(y_f32, y_ref, atol=2e-2, rtol=2e-2), "f32 path mismatch"

    # bf16 MXU path (recommended perf config: bf16 operands, f32 accumulate/epilogue)
    y_bf16 = jax.block_until_ready(downscale_block_forward(x, weight, bias))
    assert y_bf16.shape == (N, C_OUT, H // 2, W // 2), y_bf16.shape
    assert jnp.allclose(y_bf16, y_ref, atol=5e-2, rtol=5e-2), "bf16 path mismatch"

    # ---- test 2: exercise the tiled pixel axis + >=2 grid steps with N=1 ----
    k2x, k2w, k2b = jax.random.split(jax.random.PRNGKey(1), 3)
    N2, C2, OC2, H2, W2 = 1, 16, 32, 64, 64
    x2 = jax.random.normal(k2x, (N2, C2, H2, W2), dtype=jnp.float32)
    w2 = jax.random.normal(k2w, (OC2, C2, 2, 2), dtype=jnp.float32) * 0.1
    b2 = jax.random.normal(k2b, (OC2,), dtype=jnp.float32) * 0.1

    y2 = jax.block_until_ready(downscale_block_forward(x2, w2, b2))
    y2_ref = jax.block_until_ready(_reference_forward(x2, w2, b2))
    assert y2.shape == (N2, OC2, H2 // 2, W2 // 2), y2.shape
    assert jnp.allclose(y2, y2_ref, atol=5e-2, rtol=5e-2), "tiled bf16 path mismatch"

    print("KERNEL_OK")
</pallas_src>

<mosaic_0001>
module attributes {stable_mosaic.version = 11 : i64} {
  func.func @_conv2x2_relu_kernel(%arg0: i32, %arg1: i32, %arg2: memref<1x16x64xf32, #tpu.memory_space<vmem>>, %arg3: memref<8x16xf32, #tpu.memory_space<vmem>>, %arg4: memref<8x1xf32, #tpu.memory_space<vmem>>, %arg5: memref<1x8x64xf32, #tpu.memory_space<vmem>>) attributes {dimension_semantics = [#tpu.dimension_semantics<parallel>, #tpu.dimension_semantics<parallel>], iteration_bounds = array<i64: 2, 1>, scalar_prefetch = 0 : i64, scratch_operands = 0 : i64, tpu.core_type = #tpu.core_type<tc>, window_params = [{transform_indices = @transform_0, window_bounds = array<i64: 1, 16, 64>}, {pipeline_mode = #tpu.pipeline_mode<synchronous>, transform_indices = @transform_1, window_bounds = array<i64: 8, 16>}, {pipeline_mode = #tpu.pipeline_mode<synchronous>, transform_indices = @transform_2, window_bounds = array<i64: 8, 1>}, {transform_indices = @transform_3, window_bounds = array<i64: 1, 8, 64>}]} {
    %c0 = arith.constant 0 : index
    %c0_0 = arith.constant 0 : index
    %0 = vector.load %arg3[%c0, %c0_0] : memref<8x16xf32, #tpu.memory_space<vmem>>, vector<8x16xf32>
    %c0_1 = arith.constant 0 : index
    %c0_2 = arith.constant 0 : index
    %c0_3 = arith.constant 0 : index
    %1 = vector.load %arg2[%c0_1, %c0_2, %c0_3] : memref<1x16x64xf32, #tpu.memory_space<vmem>>, vector<1x16x64xf32>
    %2 = vector.shape_cast %1 : vector<1x16x64xf32> to vector<16x64xf32>
    %cst = arith.constant dense<0.000000e+00> : vector<8x64xf32>
    %3 = tpu.matmul %0, %2, %cst {dimension_numbers = #tpu.dot_dimension_numbers<[1], [0], [0], [1], [0, 0, 1, 1], [], []>} : vector<8x16xf32>, vector<16x64xf32>, vector<8x64xf32> -> vector<8x64xf32>
    %c0_4 = arith.constant 0 : index
    %c0_5 = arith.constant 0 : index
    %4 = vector.load %arg4[%c0_4, %c0_5] : memref<8x1xf32, #tpu.memory_space<vmem>>, vector<8x1xf32>
    %5 = vector.broadcast %4 : vector<8x1xf32> to vector<8x64xf32>
    %6 = arith.addf %3, %5 : vector<8x64xf32>
    %cst_6 = arith.constant 0.000000e+00 : f32
    %7 = vector.broadcast %cst_6 : f32 to vector<8x64xf32>
    %8 = arith.maximumf %6, %7 : vector<8x64xf32>
    %c0_7 = arith.constant 0 : index
    %c0_8 = arith.constant 0 : index
    %c0_9 = arith.constant 0 : index
    %9 = vector.load %arg5[%c0_7, %c0_8, %c0_9] : memref<1x8x64xf32, #tpu.memory_space<vmem>>, vector<1x8x64xf32>
    %10 = vector.shape_cast %9 : vector<1x8x64xf32> to vector<8x64xf32>
    %11 = vector.shape_cast %8 : vector<8x64xf32> to vector<1x8x64xf32>
    tpu.vector_store %arg5[%c0_7, %c0_8, %c0_9], %11 {strides = array<i32>} : memref<1x8x64xf32, #tpu.memory_space<vmem>>, vector<1x8x64xf32>,
    return
  }
  func.func @transform_0(%arg0: i32, %arg1: i32) -> (i32, i32, i32) {
    %c0_i32 = arith.constant 0 : i32
    %c0_i32_0 = arith.constant 0 : i32
    return %arg0, %c0_i32, %arg1 : i32, i32, i32
  }
  func.func @transform_1(%arg0: i32, %arg1: i32) -> (i32, i32) {
    %c0_i32 = arith.constant 0 : i32
    %c0_i32_0 = arith.constant 0 : i32
    %c0_i32_1 = arith.constant 0 : i32
    return %c0_i32, %c0_i32_0 : i32, i32
  }
  func.func @transform_2(%arg0: i32, %arg1: i32) -> (i32, i32) {
    %c0_i32 = arith.constant 0 : i32
    %c0_i32_0 = arith.constant 0 : i32
    %c0_i32_1 = arith.constant 0 : i32
    return %c0_i32, %c0_i32_0 : i32, i32
  }
  func.func @transform_3(%arg0: i32, %arg1: i32) -> (i32, i32, i32) {
    %c0_i32 = arith.constant 0 : i32
    %c0_i32_0 = arith.constant 0 : i32
    return %arg0, %c0_i32, %arg1 : i32, i32, i32
  }
}

</mosaic_0001>

<bundles_post_ra>
// kernel: downscale_block_forward.1
= control target key start
LH: loop header
LB: loop body
LE: loop exit
PB: predicated region body
PF: predicated region fallthrough
CT: control target
= control target key end

     0   :  { %s460_s12 = smov 0   ;;  %s462_s13 = smov 0   ;;  %s499_s0 = inlined_call_operand.vmem [shape: f32[2,16,64], index: 0, kind: input, shape index: {}]   ;;  %s500_s1 = inlined_call_operand.vmem [shape: f32[8,16], index: 1, kind: input, shape index: {}]   ;;  %s501_s2 = inlined_call_operand.vmem [shape: f32[8,1], index: 2, kind: input, shape index: {}]   ;;  %s502_s3 = inlined_call_operand.vmem [shape: f32[2,8,64], index: 3, kind: output, shape index: {}]  }
   0x1   :  { %s464_s14 = smov 0  }
   0x2 LB: > { %s25_s15 = sadd.s32 1, %s431_s13  ;;  %p367_p0 = scmp.ge.s32.totalorder %s435_s14, 1  ;;  %s435_s14 = sphi %s464_s14, %s13_s14   ;;  %s431_s13 = sphi %s462_s13, %s504_s13   ;;  %s427_s12 = sphi %s460_s12, %s503_s12  }
   0x3   : > { %p27_p1 = scmp.ge.s32.totalorder %s25_s15, 2  ;;  %p156_p2 = scmp.lt.s32.totalorder %s435_s14, 3 }
   0x5   : > { %s506_s15 = smov (%p27_p1, %s25_s15), 0  ;;  %p157_p3 = pnand %p367_p0, %p156_p2 }
   0x6   : > { %p185_p4 = scmp.lt.s32.totalorder (!%p157_p3), %s427_s12, 1 }
   0x7   : > { %160 = sbr.rel (%p157_p3) target bundleno = 217 (0xd9), region = 32 }
   0xc   : > { %v437_v0 = vmov 0.0   ;;  %vm438_vm0 = vmmov 0   ;;  %v203_v1 = vld [vmem:[%s501_s2] sm:$0xff]  ;;  %s508_s12 = smov (!%p185_p4, %s427_s12), 1  ;;  %v439_v2 = vmov 0   ;;  %vm209_vm1 = vcmask 130048  }
   0xd   : > { %378 = vmatprep.subr.mxu0 %v437_v0  ;;  %382 = vmatprep.mubr.msk.f32.mxu0 %vm438_vm0, %v437_v0  ;;  %s374_s18 = sshll.u32 %s508_s12, 4  ;;  %v200_v5 = vld [vmem:[%s500_s1] sm:$0xff]  ;;  %s370_s24 = sshll.u32 %s508_s12, 3  ;;  %vm284_vm2 = vcmask 523264  }
   0xe   : > { %412 = vset.pattern.permute.xlu0 %v439_v2  ;;  %s192_s21 = scalar_lea.vmem %s499_s0, %s374_s18  ;;  %s199_s27 = scalar_lea.vmem %s502_s3, %s370_s24 }
   0xf   : > { %206 = vperm.xlu0 %412, %v203_v1   ;;  %v202_v3 = vld [vmem:[%s192_s21 + $0x8] sm:$0xff]  ;;  %v201_v4 = vld [vmem:[%s192_s21] sm:$0xff] }
  0x10   : > { %379 = vmatpush3.msra.mxu0 %v202_v3 }
  0x11   : > { %380 = vmatprep.subr.mxu0 %v437_v0 }
  0x12   : > { %381 = vmatpush3.msra.mxu0 %v201_v4 }
  0x13   : > { %383 = vmatmul.mubr.msk.f32.vlgmr.msra.gmra.mxu0 %vm209_vm1, %v200_v5 }
  0x8a   : > { %v207_v6 = vpop.permute.xlu0 %206 }
  0xd3   : > { %v279_v7 = vpop.f32.mrf.mxu0 }
  0xd4   : > { %v280_v8 = vadd.f32 %v279_v7, %v207_v6 }
  0xd5   : > { %v384_v9 = vpop.f32.mrf.mxu0 }
  0xd6   : > { %v283_v10 = vmax.f32 %v280_v8, 0.0 }
  0xd8   : > { %285 = vst.msk [vmem:[%s199_s27] sm:$0xff] %vm284_vm2, %v283_v10 }
  0xd9 PF: > { %s13_s14 = sadd.s32 1, %s435_s14   ;;  %s503_s12 = smov %s431_s13 }
  0xda   : > { %p10_p5 = scmp.ge.s32.totalorder %s13_s14, 4   ;;  %s504_s13 = smov %s506_s15 }
  0xdc   :  { %12 = sbr.rel (!%p10_p5) target bundleno = 2 (0x2), region = 62 }

</bundles_post_ra>
